<compile_context>
chip_gen: v7x
topology: tpu7x:2x2x1
jax: 0.10.0
libtpu: 0.0.40
codegen_flags: <defaults>
</compile_context>

<pallas_src>
import math

import jax
import jax.numpy as jnp
import numpy as np
from jax.experimental import pallas as pl
from jax.experimental.pallas import tpu as pltpu


# ---------------------------------------------------------------------------
# Primary path: zero-copy flatten (no-op kernel, output aliases the input).
# ---------------------------------------------------------------------------
def _alias_noop_kernel(x_hbm_ref, o_hbm_ref):
    # The output aliases the input buffer (input_output_aliases={0: 0}) and
    # flatten is purely a metadata change, so there is nothing to compute and
    # no DMA to issue: leaving both ANY-space refs untouched emits zero
    # HBM<->VMEM traffic.
    del x_hbm_ref, o_hbm_ref


def flatten(x: jax.Array) -> jax.Array:
    """torch `x.view(x.size(0), -1)` as a zero-copy aliased Pallas call.

    For the alias to avoid a defensive copy, call under
    `jax.jit(flatten, donate_argnums=0)` (or otherwise donate `x`).
    """
    n = x.shape[0]
    flat = math.prod(x.shape[1:]) if x.ndim > 1 else 1
    x2d = x.reshape(n, flat)  # metadata-only reshape on a contiguous array

    return pl.pallas_call(
        _alias_noop_kernel,
        out_shape=jax.ShapeDtypeStruct((n, flat), x.dtype),
        in_specs=[pl.BlockSpec(memory_space=pl.ANY)],
        out_specs=pl.BlockSpec(memory_space=pl.ANY),
        input_output_aliases={0: 0},
        cost_estimate=pl.CostEstimate(
            flops=0, transcendentals=0, bytes_accessed=0),
    )(x2d)


# ---------------------------------------------------------------------------
# Fallback path: tuned HBM-roofline copy (when the input cannot be donated).
# ---------------------------------------------------------------------------
_TARGET_BLOCK_BYTES = 4 * 1024 * 1024      # ~4 MiB per tile buffer
_MAX_ROW_BYTES = 32 * 1024                 # cap one slab row at 32 KiB


def _copy_kernel(x_ref, o_ref):
    # Pure lane-dense tile copy.
    o_ref[...] = x_ref[...]


def _sublane_multiple(dtype) -> int:
    """Required granularity of the second-to-last block dim."""
    itemsize = np.dtype(dtype).itemsize
    if itemsize >= 4:
        return 8
    if itemsize == 2:
        return 16
    return 32  # int8 / fp8


def _dense_slab(total: int, itemsize: int):
    """Byte-identical (rows, lanes) view with a 128-multiple lane extent."""
    if total % 128 != 0:
        return None
    lane_cap = max(128, _MAX_ROW_BYTES // itemsize)
    lanes = 128
    while lanes * 2 <= lane_cap and total % (lanes * 2) == 0:
        lanes *= 2
    return total // lanes, lanes


def _pick_block(extent: int, granule: int, max_elems: int) -> int:
    """Largest legal block dim: full extent if it fits, else a granule multiple."""
    if extent <= max_elems:
        return extent                      # full array extent is always legal
    return max(granule, (max_elems // granule) * granule)


def flatten_copy(x: jax.Array) -> jax.Array:
    """torch `x.view(x.size(0), -1)` as an explicit HBM-roofline copy."""
    n = x.shape[0]
    flat = math.prod(x.shape[1:]) if x.ndim > 1 else 1
    total = n * flat
    itemsize = np.dtype(x.dtype).itemsize
    sub = _sublane_multiple(x.dtype)

    slab = _dense_slab(total, itemsize)
    rows, lanes = slab if slab is not None else (n, flat)
    x_slab = x.reshape(rows, lanes)

    # Size tiles by bytes (~4 MiB per buffer) rather than element counts.
    block_lanes = _pick_block(
        lanes, 128, max(128, _TARGET_BLOCK_BYTES // itemsize))
    block_rows = _pick_block(
        rows, sub, max(sub, _TARGET_BLOCK_BYTES // (block_lanes * itemsize)))

    grid = (pl.cdiv(rows, block_rows), pl.cdiv(lanes, block_lanes))

    out = pl.pallas_call(
        _copy_kernel,
        out_shape=jax.ShapeDtypeStruct((rows, lanes), x.dtype),
        grid=grid,
        in_specs=[pl.BlockSpec((block_rows, block_lanes), lambda i, j: (i, j))],
        out_specs=pl.BlockSpec((block_rows, block_lanes), lambda i, j: (i, j)),
        cost_estimate=pl.CostEstimate(
            flops=0, transcendentals=0, bytes_accessed=2 * total * itemsize),
        compiler_params=pltpu.CompilerParams(
            dimension_semantics=("parallel", "parallel"),
            vmem_limit_bytes=48 * 1024 * 1024),
    )(x_slab)
    return out.reshape(n, flat)


if __name__ == "__main__":
    key = jax.random.PRNGKey(0)
    # Small NCHW input: batch=2, channels=4, spatial=16x16.
    x = jax.random.normal(key, (2, 4, 16, 16), dtype=jnp.float32)

    # Host-side reference, immune to the buffer donation below.
    y_ref = np.asarray(x).reshape(x.shape[0], -1)

    # --- primary path: zero-copy aliased kernel; donate x so the alias pays off.
    flatten_zero_copy = jax.jit(flatten, donate_argnums=0)
    y = flatten_zero_copy(x)
    jax.block_until_ready(y)
    assert y.shape == (2, 4 * 16 * 16), y.shape
    assert y.dtype == jnp.float32
    assert np.array_equal(np.asarray(y), y_ref), "zero-copy flatten mismatch"

    # --- fallback path: tuned roofline copy (no donation required).
    x2 = jax.random.normal(jax.random.PRNGKey(1), (2, 4, 16, 16),
                           dtype=jnp.float32)
    y2 = flatten_copy(x2)
    jax.block_until_ready(y2)
    assert np.array_equal(
        np.asarray(y2), np.asarray(x2).reshape(x2.shape[0], -1)
    ), "copy flatten mismatch"

    print("KERNEL_OK")
</pallas_src>

<mosaic_0001>
module attributes {stable_mosaic.version = 11 : i64} {
  func.func @_alias_noop_kernel(%arg0: memref<2x1024xf32, #tpu.memory_space<any>>, %arg1: memref<2x1024xf32, #tpu.memory_space<any>>) attributes {dimension_semantics = [], scalar_prefetch = 0 : i64, scratch_operands = 0 : i64, tpu.core_type = #tpu.core_type<tc>} {
    return
  }
}

</mosaic_0001>

<bundles_post_ra>
// kernel: flatten.1
= control target key start
LH: loop header
LB: loop body
LE: loop exit
PB: predicated region body
PF: predicated region fallthrough
CT: control target
= control target key end

     0   :  { %s16_s0 = inlined_call_operand.hbm [shape: f32[2,1024], index: 0, kind: input, shape index: {}, may-alias: {0,1}]   ;;  %s17_s1 = inlined_call_operand.hbm [shape: f32[2,1024], index: 1, kind: output, shape index: {}, may-alias: {0,1}]  }

</bundles_post_ra>
